<compile_context>
chip_gen: v7x
topology: tpu7x:2x2x1
jax: 0.10.0
libtpu: 0.0.40
codegen_flags: <defaults>
</compile_context>

<pallas_src>
import jax
import jax.numpy as jnp
from jax.experimental import pallas as pl
from jax.experimental.pallas import tpu as pltpu


_INV_SQRT2 = 0.7071067811865476


def _gelu_exact(x):
    # nn.GELU() default is the exact (erf) formulation.
    return 0.5 * x * (1.0 + jax.lax.erf(x * _INV_SQRT2))


def tail_kernel(x_ref, w1_ref, b1_ref, w23_ref, b23_ref, o_ref):
    # x_ref   : (1, C_in, ts)          rows-in-lanes input tile (lane axis = spatial)
    # w1_ref  : (NC, C_in)             all tails' 1x1x1 convs stacked, compute dtype
    # b1_ref  : (NC, 1)                f32
    # w23_ref : (nt, patch_dim, C_in)  per-tail fused convT@conv2 weight, compute dtype
    # b23_ref : (ND, 1)                f32
    # o_ref   : (1, ND, ts)            output tile (bf16 by default)
    nt, patch_dim, c_in = w23_ref.shape

    # Cast the activation tile to the MXU compute dtype inside the kernel (VPU
    # cast; avoids an extra wrapper-side HBM pass over x).
    x = x_ref[0].astype(w1_ref.dtype)

    # Stage 1: one stacked matmul for every tail; f32 accumulation, f32 bias+GELU.
    h1 = jnp.dot(w1_ref[...], x, preferred_element_type=jnp.float32) + b1_ref[...]
    h1 = _gelu_exact(h1)
    h1c = h1.astype(w23_ref.dtype)

    # Stage 2: per-tail dots on static sublane slices (exploits the block-diagonal
    # structure instead of materialising a mostly-zero (ND, NC) weight).
    for t in range(nt):
        ht = h1c[t * c_in:(t + 1) * c_in, :]
        yt = (jnp.dot(w23_ref[t], ht, preferred_element_type=jnp.float32)
              + b23_ref[t * patch_dim:(t + 1) * patch_dim, :])
        o_ref[0, t * patch_dim:(t + 1) * patch_dim, :] = yt.astype(o_ref.dtype)


def _round_up(x, m):
    return ((x + m - 1) // m) * m


def _pick_tile(S, tile_s):
    """Balanced lane-tile size ~tile_s, multiple of 128, no padding blow-up."""
    n_tiles = max(1, -(-S // tile_s))
    ts = _round_up(-(-S // n_tiles), 128)
    if ts >= S:
        return S, 1            # single full-extent block: no padding, no masking
    return ts, -(-S // ts)     # ragged last block handled by Pallas masking


def _vmem_limit_bytes(C_in, NC, ND, num_tails, patch_dim, ts,
                      in_dtype, compute_dtype, out_dtype):
    ib = jnp.dtype(in_dtype).itemsize
    cb = jnp.dtype(compute_dtype).itemsize
    ob = jnp.dtype(out_dtype).itemsize
    need = (2 * C_in * ts * ib                                   # x tiles (double-buffered)
            + 2 * ND * ts * ob                                   # out tiles (double-buffered)
            + (NC * C_in + num_tails * patch_dim * C_in) * cb    # single-buffered weights
            + (NC + ND) * 4                                      # f32 biases
            + (NC + ND) * ts * 4)                                # f32 h1 / pre-cast y values
    # 2x head-room + 8 MiB compiler scratch; never below 16 MiB, capped well under
    # v7x's 64 MiB physical VMEM so we don't over-reserve.
    return int(min(max(2 * need + (8 << 20), 16 << 20), 40 << 20))


def tail_ensemble_forward(x, fused_params, patch_size, output_dim, num_tails,
                          tile_s=8192, compute_dtype=jnp.bfloat16,
                          out_dtype=jnp.bfloat16):
    """x: (B, C_in, T, H, W) -> (B, num_tails, output_dim, T*p0, H*p1, W*p2)."""
    w1t, b1, w23, b23 = fused_params
    B, C_in, T, H, W = x.shape
    p0, p1, p2 = patch_size
    P = p0 * p1 * p2
    patch_dim = output_dim * P
    NC = num_tails * C_in
    ND = num_tails * patch_dim
    S = T * H * W

    # (B, C_in, T, H, W) -> (B, C_in, S): contiguous reshape, no transpose, no pad.
    x_flat = x.reshape(B, C_in, S)

    # Weights -> MXU compute dtype (tiny, one-off); biases stay f32.
    w1t_c = w1t.astype(compute_dtype)
    w23_c = w23.astype(compute_dtype)
    b1_f = b1.astype(jnp.float32)
    b23_f = b23.astype(jnp.float32)

    ts, n_blocks = _pick_tile(S, tile_s)
    grid = (B, n_blocks)
    vmem_limit = _vmem_limit_bytes(C_in, NC, ND, num_tails, patch_dim, ts,
                                   x.dtype, compute_dtype, out_dtype)

    const2 = lambda b, s: (0, 0)
    const3 = lambda b, s: (0, 0, 0)
    out = pl.pallas_call(
        tail_kernel,
        out_shape=jax.ShapeDtypeStruct((B, ND, S), out_dtype),
        grid_spec=pltpu.PrefetchScalarGridSpec(
            num_scalar_prefetch=0,
            grid=grid,
            in_specs=[
                pl.BlockSpec((1, C_in, ts), lambda b, s: (b, 0, s)),
                # Constant operands: single-buffered (their block never changes).
                pl.BlockSpec((NC, C_in), const2, pipeline_mode=pl.Buffered(1)),
                pl.BlockSpec((NC, 1), const2, pipeline_mode=pl.Buffered(1)),
                pl.BlockSpec((num_tails, patch_dim, C_in), const3,
                             pipeline_mode=pl.Buffered(1)),
                pl.BlockSpec((ND, 1), const2, pipeline_mode=pl.Buffered(1)),
            ],
            out_specs=pl.BlockSpec((1, ND, ts), lambda b, s: (b, 0, s)),
        ),
        compiler_params=pltpu.CompilerParams(
            dimension_semantics=("parallel", "parallel"),
            vmem_limit_bytes=vmem_limit,
        ),
    )(x_flat, w1t_c, b1_f, w23_c, b23_f)

    # Un-patchify glue (reshape/transpose in out_dtype — bf16 halves this pass).
    # out[b, t*patch_dim + c*P + q, s], q = i*p1*p2 + j*p2 + k, s = ti*H*W + h*W + w
    # is the value ConvTranspose3d writes at [b, t, c, ti*p0+i, h*p1+j, w*p2+k].
    # TODO(synk): fold the coarse (T,p0)x(H,p1) interleave into the output
    # BlockSpec index_map so only the innermost W x p2 interleave is left to XLA.
    y = out.reshape(B, num_tails, output_dim, p0, p1, p2, T, H, W)
    y = jnp.transpose(y, (0, 1, 2, 6, 3, 7, 4, 8, 5))
    return y.reshape(B, num_tails, output_dim, T * p0, H * p1, W * p2)


def fuse_params(raw, output_dim, patch_size):
    """Fold (conv2, convT) into one per-tail linear map; stack tails for stage 1."""
    w1, b1, w2, b2, wt, bt = raw
    num_tails, C_in, _ = w1.shape
    p0, p1, p2 = patch_size
    P = p0 * p1 * p2
    patch_dim = output_dim * P
    NC = num_tails * C_in
    ND = num_tails * patch_dim

    # Stage 1: all tails stacked along the output-channel (sublane) dim.
    w1t = w1.reshape(NC, C_in)            # [t*C_in + o, i] = w1[t, o, i]
    b1c = b1.reshape(NC, 1)

    # Exact fusion of Conv3d(1x1x1) and grouped ConvTranspose3d (kernel==stride):
    #  y[c*P+q] = sum_m wt[c,m,q] * (sum_o w2[c*P+m,o] h1[o] + b2[c*P+m]) + bt[c]
    w2g = w2.reshape(num_tails, output_dim, P, C_in)
    b2g = b2.reshape(num_tails, output_dim, P)
    w23 = jnp.einsum('tcmq,tcmo->tcqo', wt, w2g).reshape(num_tails, patch_dim, C_in)
    b23 = (jnp.einsum('tcmq,tcm->tcq', wt, b2g)
           + bt[:, :, None]).reshape(ND, 1)
    return w1t, b1c, w23, b23


def make_params(key, num_tails, input_dim, output_dim, patch_size):
    """Deterministic synthetic parameters matching the nn.Module's shapes."""
    p0, p1, p2 = patch_size
    P = p0 * p1 * p2
    patch_dim = output_dim * P
    ks = jax.random.split(key, 6)
    # Conv3d(input_dim, input_dim, k=1):      weight (out, in), bias (out,)
    w1 = jax.random.normal(ks[0], (num_tails, input_dim, input_dim), jnp.float32) * 0.1
    b1 = jax.random.normal(ks[1], (num_tails, input_dim), jnp.float32) * 0.1
    # Conv3d(input_dim, patch_dim, k=1)
    w2 = jax.random.normal(ks[2], (num_tails, patch_dim, input_dim), jnp.float32) * 0.1
    b2 = jax.random.normal(ks[3], (num_tails, patch_dim), jnp.float32) * 0.1
    # ConvTranspose3d(patch_dim, output_dim, k=stride=patch, groups=output_dim):
    # per-group weight (P, P): [input channel m of group c, flattened kernel pos q]
    wt = jax.random.normal(ks[4], (num_tails, output_dim, P, P), jnp.float32) * 0.1
    bt = jax.random.normal(ks[5], (num_tails, output_dim), jnp.float32) * 0.1
    raw = (w1, b1, w2, b2, wt, bt)
    fused = fuse_params(raw, output_dim, patch_size)
    return fused, raw


def reference_forward(x, raw, patch_size, output_dim):
    """Pure-JAX reference mirroring the PyTorch module semantics tail by tail."""
    w1, b1, w2, b2, wt, bt = raw
    B, C_in, T, H, W = x.shape
    p0, p1, p2 = patch_size
    P = p0 * p1 * p2
    num_tails = w1.shape[0]
    xr = x.reshape(B, C_in, -1)                                  # (B, C_in, S)
    outs = []
    for t in range(num_tails):
        h1 = jnp.einsum('oi,bis->bos', w1[t], xr) + b1[t][None, :, None]
        h1 = _gelu_exact(h1)
        h2 = jnp.einsum('po,bos->bps', w2[t], h1) + b2[t][None, :, None]
        h2g = h2.reshape(B, output_dim, P, -1)
        y = (jnp.einsum('bcms,cmq->bcqs', h2g, wt[t])
             + bt[t][None, :, None, None])
        outs.append(y.reshape(B, output_dim * P, -1))
    out = jnp.stack(outs, 1)                                     # (B, nt, patch_dim, S)
    y = out.reshape(B, num_tails, output_dim, p0, p1, p2, T, H, W)
    y = jnp.transpose(y, (0, 1, 2, 6, 3, 7, 4, 8, 5))
    return y.reshape(B, num_tails, output_dim, T * p0, H * p1, W * p2)


if __name__ == "__main__":
    # Small shapes consistent with the module's forward (S = 192).
    B, C_in = 2, 16
    T, H, W = 3, 8, 8
    output_dim = 4
    patch_size = (2, 2, 2)      # patch_dim = 32, ND = num_tails*32 = 96
    num_tails = 3

    key = jax.random.PRNGKey(0)
    kx, kp = jax.random.split(key)
    x = jax.random.normal(kx, (B, C_in, T, H, W), jnp.float32)
    fused, raw = make_params(kp, num_tails, C_in, output_dim, patch_size)

    y_ref = reference_forward(x, raw, patch_size, output_dim)
    out_shape = (B, num_tails, output_dim,
                 T * patch_size[0], H * patch_size[1], W * patch_size[2])

    # Production path: bf16 MXU inputs + bf16 output (deliberate precision trade).
    y_bf16 = tail_ensemble_forward(x, fused, patch_size, output_dim, num_tails)
    y_bf16 = jax.block_until_ready(y_bf16)
    assert y_bf16.shape == out_shape
    assert y_bf16.dtype == jnp.bfloat16
    assert jnp.allclose(y_bf16.astype(jnp.float32), y_ref, atol=5e-2, rtol=5e-2), \
        "bf16 path mismatch vs reference"

    # f32 fallback path: exact algebra, tight tolerance.
    y_f32 = tail_ensemble_forward(x, fused, patch_size, output_dim, num_tails,
                                  compute_dtype=jnp.float32, out_dtype=jnp.float32)
    y_f32 = jax.block_until_ready(y_f32)
    assert jnp.allclose(y_f32, y_ref, atol=1e-4, rtol=1e-4), \
        "f32 path mismatch vs reference"

    # Exercise the ragged-last-block path (no pad / no slice): S=192 with 128-wide tiles.
    y_rag = tail_ensemble_forward(x, fused, patch_size, output_dim, num_tails,
                                  tile_s=128, compute_dtype=jnp.float32,
                                  out_dtype=jnp.float32)
    y_rag = jax.block_until_ready(y_rag)
    assert jnp.allclose(y_rag, y_ref, atol=1e-4, rtol=1e-4), \
        "ragged-tile path mismatch vs reference"

    print("KERNEL_OK")
</pallas_src>

<mosaic_0001>
module attributes {stable_mosaic.version = 11 : i64} {
  func.func @tail_kernel(%arg0: i32, %arg1: i32, %arg2: memref<1x16x192xf32, #tpu.memory_space<vmem>>, %arg3: memref<48x16xbf16, #tpu.memory_space<vmem>>, %arg4: memref<48x1xf32, #tpu.memory_space<vmem>>, %arg5: memref<3x32x16xbf16, #tpu.memory_space<vmem>>, %arg6: memref<96x1xf32, #tpu.memory_space<vmem>>, %arg7: memref<1x96x192xbf16, #tpu.memory_space<vmem>>) attributes {dimension_semantics = [#tpu.dimension_semantics<parallel>, #tpu.dimension_semantics<parallel>], iteration_bounds = array<i64: 2, 1>, scalar_prefetch = 0 : i64, scratch_operands = 0 : i64, tpu.core_type = #tpu.core_type<tc>, window_params = [{transform_indices = @transform_0, window_bounds = array<i64: 1, 16, 192>}, {pipeline_mode = #tpu.pipeline_mode<synchronous>, transform_indices = @transform_1, window_bounds = array<i64: 48, 16>}, {pipeline_mode = #tpu.pipeline_mode<synchronous>, transform_indices = @transform_2, window_bounds = array<i64: 48, 1>}, {pipeline_mode = #tpu.pipeline_mode<synchronous>, transform_indices = @transform_3, window_bounds = array<i64: 3, 32, 16>}, {pipeline_mode = #tpu.pipeline_mode<synchronous>, transform_indices = @transform_4, window_bounds = array<i64: 96, 1>}, {transform_indices = @transform_5, window_bounds = array<i64: 1, 96, 192>}]} {
    %c0 = arith.constant 0 : index
    %c0_0 = arith.constant 0 : index
    %c0_1 = arith.constant 0 : index
    %0 = vector.load %arg2[%c0, %c0_0, %c0_1] : memref<1x16x192xf32, #tpu.memory_space<vmem>>, vector<1x16x192xf32>
    %1 = vector.shape_cast %0 : vector<1x16x192xf32> to vector<16x192xf32>
    %2 = arith.truncf %1 : vector<16x192xf32> to vector<16x192xbf16>
    %c0_2 = arith.constant 0 : index
    %c0_3 = arith.constant 0 : index
    %3 = vector.load %arg3[%c0_2, %c0_3] : memref<48x16xbf16, #tpu.memory_space<vmem>>, vector<48x16xbf16>
    %cst = arith.constant dense<0.000000e+00> : vector<48x192xf32>
    %4 = tpu.matmul %3, %2, %cst {dimension_numbers = #tpu.dot_dimension_numbers<[1], [0], [0], [1], [0, 0, 1, 1], [], []>} : vector<48x16xbf16>, vector<16x192xbf16>, vector<48x192xf32> -> vector<48x192xf32>
    %c0_4 = arith.constant 0 : index
    %c0_5 = arith.constant 0 : index
    %5 = vector.load %arg4[%c0_4, %c0_5] : memref<48x1xf32, #tpu.memory_space<vmem>>, vector<48x1xf32>
    %6 = vector.broadcast %5 : vector<48x1xf32> to vector<48x192xf32>
    %7 = arith.addf %4, %6 : vector<48x192xf32>
    %cst_6 = arith.constant 5.000000e-01 : f32
    %8 = vector.broadcast %cst_6 : f32 to vector<48x192xf32>
    %9 = arith.mulf %8, %7 : vector<48x192xf32>
    %cst_7 = arith.constant 0.707106769 : f32
    %10 = vector.broadcast %cst_7 : f32 to vector<48x192xf32>
    %11 = arith.mulf %7, %10 : vector<48x192xf32>
    %12 = math.erf %11 : vector<48x192xf32>
    %cst_8 = arith.constant 1.000000e+00 : f32
    %13 = vector.broadcast %cst_8 : f32 to vector<48x192xf32>
    %14 = arith.addf %13, %12 : vector<48x192xf32>
    %15 = arith.mulf %9, %14 : vector<48x192xf32>
    %16 = arith.truncf %15 : vector<48x192xf32> to vector<48x192xbf16>
    %17 = vector.extract_strided_slice %16 {offsets = [0, 0], sizes = [16, 192], strides = [1, 1]} : vector<48x192xbf16> to vector<16x192xbf16>
    %c0_9 = arith.constant 0 : index
    %c0_10 = arith.constant 0 : index
    %c0_11 = arith.constant 0 : index
    %18 = vector.load %arg5[%c0_9, %c0_10, %c0_11] : memref<3x32x16xbf16, #tpu.memory_space<vmem>>, vector<1x32x16xbf16>
    %19 = vector.shape_cast %18 : vector<1x32x16xbf16> to vector<32x16xbf16>
    %cst_12 = arith.constant dense<0.000000e+00> : vector<32x192xf32>
    %20 = tpu.matmul %19, %17, %cst_12 {dimension_numbers = #tpu.dot_dimension_numbers<[1], [0], [0], [1], [0, 0, 1, 1], [], []>} : vector<32x16xbf16>, vector<16x192xbf16>, vector<32x192xf32> -> vector<32x192xf32>
    %c0_13 = arith.constant 0 : index
    %c0_14 = arith.constant 0 : index
    %21 = vector.load %arg6[%c0_13, %c0_14] : memref<96x1xf32, #tpu.memory_space<vmem>>, vector<32x1xf32>
    %22 = vector.broadcast %21 : vector<32x1xf32> to vector<32x192xf32>
    %23 = arith.addf %20, %22 : vector<32x192xf32>
    %24 = arith.truncf %23 : vector<32x192xf32> to vector<32x192xbf16>
    %c0_15 = arith.constant 0 : index
    %c0_16 = arith.constant 0 : index
    %c0_17 = arith.constant 0 : index
    %25 = vector.load %arg7[%c0_15, %c0_16, %c0_17] : memref<1x96x192xbf16, #tpu.memory_space<vmem>>, vector<1x32x192xbf16>
    %26 = vector.shape_cast %25 : vector<1x32x192xbf16> to vector<32x192xbf16>
    %27 = vector.shape_cast %24 : vector<32x192xbf16> to vector<1x32x192xbf16>
    tpu.vector_store %arg7[%c0_15, %c0_16, %c0_17], %27 {strides = array<i32>} : memref<1x96x192xbf16, #tpu.memory_space<vmem>>, vector<1x32x192xbf16>,
    %28 = vector.extract_strided_slice %16 {offsets = [16, 0], sizes = [16, 192], strides = [1, 1]} : vector<48x192xbf16> to vector<16x192xbf16>
    %c1 = arith.constant 1 : index
    %c0_18 = arith.constant 0 : index
    %c0_19 = arith.constant 0 : index
    %29 = vector.load %arg5[%c1, %c0_18, %c0_19] : memref<3x32x16xbf16, #tpu.memory_space<vmem>>, vector<1x32x16xbf16>
    %30 = vector.shape_cast %29 : vector<1x32x16xbf16> to vector<32x16xbf16>
    %cst_20 = arith.constant dense<0.000000e+00> : vector<32x192xf32>
    %31 = tpu.matmul %30, %28, %cst_20 {dimension_numbers = #tpu.dot_dimension_numbers<[1], [0], [0], [1], [0, 0, 1, 1], [], []>} : vector<32x16xbf16>, vector<16x192xbf16>, vector<32x192xf32> -> vector<32x192xf32>
    %c32 = arith.constant 32 : index
    %c0_21 = arith.constant 0 : index
    %32 = vector.load %arg6[%c32, %c0_21] : memref<96x1xf32, #tpu.memory_space<vmem>>, vector<32x1xf32>
    %33 = vector.broadcast %32 : vector<32x1xf32> to vector<32x192xf32>
    %34 = arith.addf %31, %33 : vector<32x192xf32>
    %35 = arith.truncf %34 : vector<32x192xf32> to vector<32x192xbf16>
    %c0_22 = arith.constant 0 : index
    %c32_23 = arith.constant 32 : index
    %c0_24 = arith.constant 0 : index
    %36 = vector.load %arg7[%c0_22, %c32_23, %c0_24] : memref<1x96x192xbf16, #tpu.memory_space<vmem>>, vector<1x32x192xbf16>
    %37 = vector.shape_cast %36 : vector<1x32x192xbf16> to vector<32x192xbf16>
    %38 = vector.shape_cast %35 : vector<32x192xbf16> to vector<1x32x192xbf16>
    tpu.vector_store %arg7[%c0_22, %c32_23, %c0_24], %38 {strides = array<i32>} : memref<1x96x192xbf16, #tpu.memory_space<vmem>>, vector<1x32x192xbf16>,
    %39 = vector.extract_strided_slice %16 {offsets = [32, 0], sizes = [16, 192], strides = [1, 1]} : vector<48x192xbf16> to vector<16x192xbf16>
    %c2 = arith.constant 2 : index
    %c0_25 = arith.constant 0 : index
    %c0_26 = arith.constant 0 : index
    %40 = vector.load %arg5[%c2, %c0_25, %c0_26] : memref<3x32x16xbf16, #tpu.memory_space<vmem>>, vector<1x32x16xbf16>
    %41 = vector.shape_cast %40 : vector<1x32x16xbf16> to vector<32x16xbf16>
    %cst_27 = arith.constant dense<0.000000e+00> : vector<32x192xf32>
    %42 = tpu.matmul %41, %39, %cst_27 {dimension_numbers = #tpu.dot_dimension_numbers<[1], [0], [0], [1], [0, 0, 1, 1], [], []>} : vector<32x16xbf16>, vector<16x192xbf16>, vector<32x192xf32> -> vector<32x192xf32>
    %c64 = arith.constant 64 : index
    %c0_28 = arith.constant 0 : index
    %43 = vector.load %arg6[%c64, %c0_28] : memref<96x1xf32, #tpu.memory_space<vmem>>, vector<32x1xf32>
    %44 = vector.broadcast %43 : vector<32x1xf32> to vector<32x192xf32>
    %45 = arith.addf %42, %44 : vector<32x192xf32>
    %46 = arith.truncf %45 : vector<32x192xf32> to vector<32x192xbf16>
    %c0_29 = arith.constant 0 : index
    %c64_30 = arith.constant 64 : index
    %c0_31 = arith.constant 0 : index
    %47 = vector.load %arg7[%c0_29, %c64_30, %c0_31] : memref<1x96x192xbf16, #tpu.memory_space<vmem>>, vector<1x32x192xbf16>
    %48 = vector.shape_cast %47 : vector<1x32x192xbf16> to vector<32x192xbf16>
    %49 = vector.shape_cast %46 : vector<32x192xbf16> to vector<1x32x192xbf16>
    tpu.vector_store %arg7[%c0_29, %c64_30, %c0_31], %49 {strides = array<i32>} : memref<1x96x192xbf16, #tpu.memory_space<vmem>>, vector<1x32x192xbf16>,
    return
  }
  func.func @transform_0(%arg0: i32, %arg1: i32) -> (i32, i32, i32) {
    %c0_i32 = arith.constant 0 : i32
    %c0_i32_0 = arith.constant 0 : i32
    return %arg0, %c0_i32, %arg1 : i32, i32, i32
  }
  func.func @transform_1(%arg0: i32, %arg1: i32) -> (i32, i32) {
    %c0_i32 = arith.constant 0 : i32
    %c0_i32_0 = arith.constant 0 : i32
    %c0_i32_1 = arith.constant 0 : i32
    return %c0_i32, %c0_i32_0 : i32, i32
  }
  func.func @transform_2(%arg0: i32, %arg1: i32) -> (i32, i32) {
    %c0_i32 = arith.constant 0 : i32
    %c0_i32_0 = arith.constant 0 : i32
    %c0_i32_1 = arith.constant 0 : i32
    return %c0_i32, %c0_i32_0 : i32, i32
  }
  func.func @transform_3(%arg0: i32, %arg1: i32) -> (i32, i32, i32) {
    %c0_i32 = arith.constant 0 : i32
    %c0_i32_0 = arith.constant 0 : i32
    %c0_i32_1 = arith.constant 0 : i32
    %c0_i32_2 = arith.constant 0 : i32
    return %c0_i32, %c0_i32_0, %c0_i32_1 : i32, i32, i32
  }
  func.func @transform_4(%arg0: i32, %arg1: i32) -> (i32, i32) {
    %c0_i32 = arith.constant 0 : i32
    %c0_i32_0 = arith.constant 0 : i32
    %c0_i32_1 = arith.constant 0 : i32
    return %c0_i32, %c0_i32_0 : i32, i32
  }
  func.func @transform_5(%arg0: i32, %arg1: i32) -> (i32, i32, i32) {
    %c0_i32 = arith.constant 0 : i32
    %c0_i32_0 = arith.constant 0 : i32
    return %arg0, %c0_i32, %arg1 : i32, i32, i32
  }
}

</mosaic_0001>

<bundles_post_ra>
// kernel: tpu_custom_call.1
= control target key start
LH: loop header
LB: loop body
LE: loop exit
PB: predicated region body
PF: predicated region fallthrough
CT: control target
= control target key end

     0   :  { %10 = vsyncpa [#allocation3], 0  ;;  %s1465_s0 = inlined_call_operand.vmem [shape: f32[2,16,192], index: 0, kind: input, shape index: {}]   ;;  %s1466_s1 = inlined_call_operand.vmem [shape: bf16[48,16], index: 1, kind: input, shape index: {}]   ;;  %s1467_s2 = inlined_call_operand.vmem [shape: f32[48,1], index: 2, kind: input, shape index: {}]   ;;  %s1468_s3 = inlined_call_operand.vmem [shape: bf16[3,32,16], index: 3, kind: input, shape index: {}]   ;;  %s1469_s4 = inlined_call_operand.vmem [shape: f32[96,1], index: 4, kind: input, shape index: {}]   ;;  %s1470_s5 = inlined_call_operand.hbm [shape: bf16[2,96,192], index: 5, kind: output, shape index: {}]  }
   0x1   :  { %12 = vsyncpa [#allocation3 + $0x1], 0  ;;  %s1202_s18 = smov 0   ;;  %s1204_s19 = smov 0  }
   0x2   :  { %s1206_s20 = smov 0   ;;  %s1208_s21 = smov 0  }
   0x3   :  { %s1210_s22 = smov 0   ;;  %s1212_s23 = smov 0  }
   0x4 LB: > { %s932_s24 = sadd.s32 4294967295, %s1166_s23   ;;  %s933_s25 = sadd.s32 4294967294, %s1166_s23   ;;  %s1166_s23 = sphi %s1212_s23, %s18_s23   ;;  %s1162_s22 = sphi %s1210_s22, %s1479_s22   ;;  %s1158_s21 = sphi %s1208_s21, %s1478_s21   ;;  %s1154_s20 = sphi %s1206_s20, %s1477_s20   ;;  %s1150_s19 = sphi %s1204_s19, %s1476_s19   ;;  %s1146_s18 = sphi %s1202_s18, %s1475_s18  }
   0x5   : > { %s30_s26 = sadd.s32 1, %s1162_s22  ;;  %s151_s27 = sadd.s32 1, %s1154_s20 }
   0x6   : > { %p32_p0 = scmp.ge.s32.totalorder %s30_s26, 2  ;;  %p161_p1 = scmp.ne.s32.totalorder %s1154_s20, %s1150_s19 }
   0x7   : > { %p162_p2 = scmp.eq.s32.totalorder %s932_s24, 1  ;;  %p167_p3 = scmp.ne.s32.totalorder %s1150_s19, %s1146_s18 }
   0x8   : > { %s1481_s26 = smov (%p32_p0, %s30_s26), 0  ;;  %p168_p5 = scmp.eq.s32.totalorder %s933_s25, 1 }
   0x9   : > { %p1242_p4 = por %p162_p2, %p161_p1  ;;  %s146_s29 = ssub.s32 %s1162_s22, %s1481_s26 }
   0xa   : > { %p936_p6 = scmp.ge.s32.totalorder %s1166_s23, 1  ;;  %p149_p7 = scmp.eq.s32.totalorder %s146_s29, 0 }
   0xb   : > { %p1249_p8 = por %p168_p5, %p167_p3  ;;  %p211_p9 = scmp.lt.s32.totalorder %s1166_s23, 3 }
   0xc   : > { %s1255_s6 = scalar_select %p149_p7, %s1154_s20, %s151_s27  }
   0xd   : > { %p212_p10 = pnand %p936_p6, %p211_p9 }
   0xe   : > { %p244_p11 = scmp.lt.s32.totalorder (!%p212_p10), %s1158_s21, 1  ;;  %v1168_v0 = vmov (!%p212_p10), 0   ;;  %v269_v1 = vld [vmem:[%s1467_s2 + $0x10] sm:$0xff] (!%p212_p10)  ;;  %v267_v2 = vld [vmem:[%s1467_s2] sm:$0xff] (!%p212_p10)  ;;  %v270_v3 = vld [vmem:[%s1467_s2 + $0x18] sm:$0xff] (!%p212_p10)  ;;  %vm318_vm0 = vcmask (!%p212_p10), 130048  }
   0xf   : > { %215 = sbr.rel (%p212_p10) target bundleno = 531 (0x213), region = 40  ;;  %360 = vmatprep.mubr.bf16.mxu0 (!%p212_p10), %v1168_v0  ;;  %1054 = vset.pattern.permute.xlu1 (!%p212_p10), %v1168_v0  ;;  %v268_v4 = vld [vmem:[%s1467_s2 + $0x8] sm:$0xff] (!%p212_p10)  ;;  %v1055_v11 = vld [vmem:[%s1466_s1] sm:$0xff] (!%p212_p10)   ;;  %v464_v17 = vld [vmem:[%s1469_s4 + $0x18] sm:$0xff] (!%p212_p10)  ;;  %s240_s29 = sand.u32 (!%p212_p10), 1, %s1150_s19   ;;  %vm578_vm1 = vcmask (!%p212_p10), 1043456  }
  0x10   : > { %1053 = vset.pattern.permute.xlu0 (!%p212_p10), %v1168_v0  ;;  %533 = vmatprep.mubr.bf16.mxu1 (!%p212_p10), %v1168_v0  ;;  %v272_v12 = vld [vmem:[%s1467_s2 + $0x28] sm:$0xff] (!%p212_p10)  ;;  %v271_v13 = vld [vmem:[%s1467_s2 + $0x20] sm:$0xff] (!%p212_p10)  ;;  %v463_v18 = vld [vmem:[%s1469_s4 + $0x10] sm:$0xff] (!%p212_p10)  ;;  %vm579_vm2 = vcmask (!%p212_p10), 523268   ;;  %s994_s9 = smul.u32 (!%p212_p10), 1536, %s1158_s21  ;;  %s1419_s13 = scalar_lea.sflag (!%p212_p10), [#allocation3], %s240_s29 }
  0x11   : > { %285 = vperm.xlu1 (!%p212_p10), %1054, %v269_v1   ;;  %275 = vperm.xlu0 (!%p212_p10), %1053, %v267_v2   ;;  %v462_v14 = vld [vmem:[%s1469_s4 + $0x8] sm:$0xff] (!%p212_p10)  ;;  %v461_v15 = vld [vmem:[%s1469_s4] sm:$0xff] (!%p212_p10)  ;;  %v1057_v21 = vld [vmem:[%s1466_s1 + $0x10] sm:$0xff] (!%p212_p10)  }
  0x12   : > { %v1056_v16 = vld [vmem:[%s1466_s1 + $0x8] sm:$0xff] (!%p212_p10)   ;;  %v590_v20 = vld [vmem:[%s1469_s4 + $0x20] sm:$0xff] (!%p212_p10)  ;;  %v593_v22 = vld [vmem:[%s1469_s4 + $0x38] sm:$0xff] (!%p212_p10) }
  0x13   : > { %v591_v19 = vld [vmem:[%s1469_s4 + $0x28] sm:$0xff] (!%p212_p10)  ;;  %v592_v23 = vld [vmem:[%s1469_s4 + $0x30] sm:$0xff] (!%p212_p10)  ;;  %v716_v25 = vld [vmem:[%s1469_s4 + $0x40] sm:$0xff] (!%p212_p10) }
  0x14   : > { %v717_v24 = vld [vmem:[%s1469_s4 + $0x48] sm:$0xff] (!%p212_p10)  ;;  %v719_v26 = vld [vmem:[%s1469_s4 + $0x58] sm:$0xff] (!%p212_p10)  ;;  %v718_v27 = vld [vmem:[%s1469_s4 + $0x50] sm:$0xff] (!%p212_p10) }
  0x15   : > { %290 = vperm.xlu1 (!%p212_p10), %1054, %v270_v3   ;;  %280 = vperm.xlu0 (!%p212_p10), %1053, %v268_v4   ;;  %vm1366_vm3 = vmor (!%p212_p10), %vm579_vm2, %vm578_vm1 }
  0x16   : > { %s245_s7 = scalar_select %p244_p11, %s1158_s21, 1 }
  0x18   : > { %s980_s12 = sshll.u32 %s245_s7, 5  ;;  %s993_s7 = smul.u32 96, %s240_s29 }
  0x19   : > { %s251_s15 = scalar_lea.vmem %s1465_s0, %s980_s12  ;;  %300 = vperm.xlu1 %1054, %v272_v12   ;;  %295 = vperm.xlu0 %1053, %v271_v13   ;;  %s1409_s12 = scalar_lea.hbm %s1470_s5, %s994_s9 }
  0x1a   : > { %v256_v5 = vld [vmem:[%s251_s15 + $0x8] sm:$0xff]  ;;  %v258_v6 = vld [vmem:[%s251_s15 + $0x18] sm:$0xff]  ;;  %v255_v7 = vld [vmem:[%s251_s15] sm:$0xff]  ;;  %s1370_s8 = scalar_lea.vmem [#allocation2], %s993_s7 }
  0x1b   : > { %v260_v8 = vpack.c.bf16 %v258_v6, %v256_v5  ;;  %v257_v9 = vld [vmem:[%s251_s15 + $0x10] sm:$0xff]  ;;  %s853_s10 = sshll.u32 %s1370_s8, 4  ;;  %s1169_s15 = smov [#allocation2]   ;;  %s1398_s10 = int_to_ptr.vmem [resolvable:$true] %s853_s10 }
  0x1c   : > { %v259_v10 = vpack.c.bf16 %v257_v9, %v255_v7  ;;  %s1088_s14 = scalar_lea.vmem %s1398_s10, 1536  ;;  %s1092_s16 = sshll.u32 %s1169_s15, 4  ;;  %s1093_s16 = int_to_ptr.vmem [resolvable:$false] %s1092_s16 }
  0x1d   : > { %328 = vmatprep.subr.bf16.mxu0 %v260_v8  ;;  %472 = vperm.xlu1 %1054, %v462_v14   ;;  %p1089_p12 = scmp.ne.s32.totalorder %s1398_s10, %s1088_s14  ;;  %s1094_s17 = scalar_lea.vmem %s1093_s16, 3072 }
  0x1e   : > { %329 = vmatpush1.bf16.msra.mxu0 %v259_v10  ;;  %467 = vperm.xlu0 %1053, %v461_v15   ;;  %p1095_p1 = scmp.lt.s32.totalorder %s1398_s10, %s1093_s16  ;;  %p1096_p2 = scmp.lt.s32.totalorder %s1094_s17, %s1088_s14 }
  0x1f   : > { %p1090_p13 = pnand %p1089_p12, %p1242_p4 }
  0x20   : > { %p1097_p3 = por %p1096_p2, %p1095_p1 }
  0x21   : > { %942 = vmatmul.mubr.msk.bf16.vlgmr.msra.gmra.mrb[0].mxu0 %vm318_vm0, %v1055_v11  ;;  %482 = vperm.xlu1 %1054, %v464_v17   ;;  %p1091_p0 = pneg %p1090_p13 }
  0x22   : > { %370 = vmatprep.mubr.bf16.mxu0 %v1168_v0  ;;  %477 = vperm.xlu0 %1053, %v463_v18  }
  0x23   : > { %p1098_p5 = pnand %p1097_p3, %p1091_p0 }
  0x25   : > { %601 = vperm.xlu1 %1054, %v591_v19  }
  0x26   : > { %596 = vperm.xlu0 %1053, %v590_v20  }
  0x29   : > { %943 = vmatmul.mubr.msk.bf16.gmra.mrb[4].mxu0 %vm318_vm0, %v1056_v16  ;;  %611 = vperm.xlu1 %1054, %v593_v22  }
  0x2a   : > { %380 = vmatprep.mubr.bf16.mxu0 %v1168_v0  ;;  %606 = vperm.xlu0 %1053, %v592_v23  }
  0x2d   : > { %727 = vperm.xlu1 %1054, %v717_v24  }
  0x2e   : > { %722 = vperm.xlu0 %1053, %v716_v25  }
  0x31   : > { %944 = vmatmul.mubr.msk.bf16.gmra.mrb[8].mxu0 %vm318_vm0, %v1057_v21  ;;  %737 = vperm.xlu1 %1054, %v719_v26  }
  0x32   : > { %788 = vmatprep.mubr.bf16.mxu0 %v1168_v0  ;;  %732 = vperm.xlu0 %1053, %v718_v27  }
  0x90   : > { %v276_v28 = vpop.permute.xlu0 %275  ;;  %v286_v38 = vpop.permute.xlu1 %285 }
  0x94   : > { %v281_v32 = vpop.permute.xlu0 %280  ;;  %v291_v46 = vpop.permute.xlu1 %290 }
  0x98   : > { %v296_v58 = vpop.permute.xlu0 %295  ;;  %v301_v2 = vpop.permute.xlu1 %300 }
  0xf4   : > { %v362_v29 = vpop.f32.mrb[0].mxu0 }
  0xf5   : > { %v363_v30 = vadd.f32 %v362_v29, %v276_v28  ;;  %v364_v31 = vpop.f32.mrb[1].mxu0 }
  0xf6   : > { %v365_v33 = vadd.f32 %v364_v31, %v276_v28  ;;  %v366_v34 = vpop.f32.mrb[2].mxu0 }
  0xf7   : > { %v403_v35 = vmul.f32 0.70710677, %v363_v30  ;;  %v367_v36 = vadd.f32 %v366_v34, %v281_v32  ;;  %v368_v37 = vpop.f32.mrb[3].mxu0  ;;  %v391_v13 = vmul.f32 0.5, %v363_v30  ;;  %v1058_v30 = vld [vmem:[%s1468_s3] sm:$0xff]  }
  0xf8   : > { %v404_v39 = vmul.f32 0.70710677, %v365_v33  ;;  %v369_v40 = vadd.f32 %v368_v37, %v281_v32  ;;  %v392_v3 = vmul.f32 0.5, %v365_v33 }
  0xf9   : > { %1064 = verf.f32 %v403_v35  ;;  %v405_v41 = vmul.f32 0.70710677, %v367_v36  ;;  %v393_v14 = vmul.f32 0.5, %v367_v36 }
  0xfa   : > { %1066 = verf.f32 %v404_v39  ;;  %v406_v42 = vmul.f32 0.70710677, %v369_v40  ;;  %v394_v8 = vmul.f32 0.5, %v369_v40 }
  0xfb   : > { %1068 = verf.f32 %v405_v41 }
  0xfc   : > { %1070 = verf.f32 %v406_v42  ;;  %v372_v43 = vpop.f32.mrb[4].mxu0 }
  0xfd   : > { %v373_v44 = vadd.f32 %v372_v43, %v286_v38  ;;  %v374_v45 = vpop.f32.mrb[5].mxu0 }
  0xfe   : > { %v375_v47 = vadd.f32 %v374_v45, %v286_v38  ;;  %v376_v48 = vpop.f32.mrb[6].mxu0 }
  0xff   : > { %v407_v49 = vmul.f32 0.70710677, %v373_v44  ;;  %v377_v50 = vadd.f32 %v376_v48, %v291_v46  ;;  %v378_v51 = vpop.f32.mrb[7].mxu0  ;;  %v395_v32 = vmul.f32 0.5, %v373_v44 }
 0x100   : > { %v408_v52 = vmul.f32 0.70710677, %v375_v47  ;;  %v379_v53 = vadd.f32 %v378_v51, %v291_v46  ;;  %v396_v35 = vmul.f32 0.5, %v375_v47  ;;  %v1059_v47 = vld [vmem:[%s1468_s3 + $0x8] sm:$0xff]  }
 0x101   : > { %1072 = verf.f32 %v407_v49  ;;  %v409_v54 = vmul.f32 0.70710677, %v377_v50  ;;  %v397_v33 = vmul.f32 0.5, %v377_v50 }
 0x102   : > { %1074 = verf.f32 %v408_v52  ;;  %v410_v55 = vmul.f32 0.70710677, %v379_v53  ;;  %v398_v36 = vmul.f32 0.5, %v379_v53 }
 0x103   : > { %v1065_v56 = vpop.eup %1064  ;;  %1076 = verf.f32 %v409_v54 }
 0x104   : > { %v1067_v57 = vpop.eup %1066  ;;  %1078 = verf.f32 %v410_v55  ;;  %v382_v59 = vpop.f32.mrb[8].mxu0  ;;  %v427_v6 = vadd.f32 1.0, %v1065_v56 }
 0x105   : > { %v1069_v60 = vpop.eup %1068  ;;  %v383_v61 = vadd.f32 %v382_v59, %v296_v58  ;;  %v384_v62 = vpop.f32.mrb[9].mxu0  ;;  %v428_v63 = vadd.f32 1.0, %v1067_v57 }
 0x106   : > { %v1071_v1 = vpop.eup %1070  ;;  %v385_v4 = vadd.f32 %v384_v62, %v296_v58  ;;  %v386_v5 = vpop.f32.mrb[10].mxu0  ;;  %v429_v7 = vadd.f32 1.0, %v1069_v60  ;;  %v439_v21 = vmul.f32 %v427_v6, %v391_v13 }
 0x107   : > { %v411_v9 = vmul.f32 0.70710677, %v383_v61  ;;  %v387_v10 = vadd.f32 %v386_v5, %v301_v2  ;;  %v388_v11 = vpop.f32.mrb[11].mxu0  ;;  %v430_v12 = vadd.f32 1.0, %v1071_v1  ;;  %v440_v18 = vmul.f32 %v428_v63, %v392_v3  ;;  %v1061_v1 = vld [vmem:[%s1468_s3 + $0x20] sm:$0xff]   ;;  %v1063_v3 = vld [vmem:[%s1468_s3 + $0x28] sm:$0xff]   ;;  %v468_v5 = vpop.permute.xlu0 %467 }
 0x108   : > { %v412_v15 = vmul.f32 0.70710677, %v385_v4  ;;  %v389_v16 = vadd.f32 %v388_v11, %v301_v2  ;;  %v441_v22 = vmul.f32 %v429_v7, %v393_v14  ;;  %v399_v51 = vmul.f32 0.5, %v383_v61  ;;  %v1060_v61 = vld [vmem:[%s1468_s3 + $0x10] sm:$0xff]   ;;  %v1062_v2 = vld [vmem:[%s1468_s3 + $0x18] sm:$0xff]  }
 0x109   : > { %1080 = verf.f32 %v411_v9  ;;  %v413_v17 = vmul.f32 0.70710677, %v387_v10  ;;  %v442_v19 = vmul.f32 %v430_v12, %v394_v8  ;;  %v401_v52 = vmul.f32 0.5, %v387_v10 }
 0x10a   : > { %1082 = verf.f32 %v412_v15  ;;  %v414_v20 = vmul.f32 0.70710677, %v389_v16  ;;  %v451_v27 = vpack.c.bf16 %v441_v22, %v439_v21  ;;  %v400_v54 = vmul.f32 0.5, %v385_v4  ;;  %v473_v4 = vpop.permute.xlu1 %472 }
 0x10b   : > { %v1073_v23 = vpop.eup %1072  ;;  %1084 = verf.f32 %v413_v17  ;;  %v452_v24 = vpack.c.bf16 %v442_v19, %v440_v18  ;;  %v402_v55 = vmul.f32 0.5, %v389_v16  ;;  %v478_v7 = vpop.permute.xlu0 %477 }
 0x10c   : > { %v1075_v25 = vpop.eup %1074  ;;  %v431_v26 = vadd.f32 1.0, %v1073_v23  ;;  %1086 = verf.f32 %v414_v20 }
 0x10d   : > { %v1077_v28 = vpop.eup %1076  ;;  %v432_v29 = vadd.f32 1.0, %v1075_v25  ;;  %501 = vmatprep.subr.bf16.mxu1 %v452_v24 }
 0x10e   : > { %v1079_v31 = vpop.eup %1078  ;;  %v433_v34 = vadd.f32 1.0, %v1077_v28  ;;  %502 = vmatpush1.bf16.msra.mxu1 %v451_v27  ;;  %v443_v38 = vmul.f32 %v431_v26, %v395_v32  ;;  %v483_v6 = vpop.permute.xlu1 %482 }
 0x10f   : > { %v434_v37 = vadd.f32 1.0, %v1079_v31  ;;  %v444_v40 = vmul.f32 %v432_v29, %v396_v35  ;;  %v597_v13 = vpop.permute.xlu0 %596 }
 0x110   : > { %v445_v39 = vmul.f32 %v433_v34, %v397_v33 }
 0x111   : > { %v446_v41 = vmul.f32 %v434_v37, %v398_v36  ;;  %947 = vmatmul.mubr.msk.bf16.vlgmr.msra.gmra.mrb[0].mxu1 %vm318_vm0, %v1058_v30 }
 0x112   : > { %v453_v42 = vpack.c.bf16 %v445_v39, %v443_v38  ;;  %543 = vmatprep.mubr.bf16.mxu1 %v1168_v0  ;;  %v602_v10 = vpop.permute.xlu1 %601 }
 0x113   : > { %v1081_v43 = vpop.eup %1080  ;;  %v454_v45 = vpack.c.bf16 %v446_v41, %v444_v40  ;;  %v607_v22 = vpop.permute.xlu0 %606 }
 0x114   : > { %v1083_v46 = vpop.eup %1082  ;;  %v435_v48 = vadd.f32 1.0, %v1081_v43 }
 0x115   : > { %v1085_v44 = vpop.eup %1084  ;;  %v436_v49 = vadd.f32 1.0, %v1083_v46  ;;  %630 = vmatprep.subr.bf16.mxu1 %v454_v45 }
 0x116   : > { %v1087_v50 = vpop.eup %1086  ;;  %v437_v53 = vadd.f32 1.0, %v1085_v44  ;;  %631 = vmatpush1.bf16.msra.mxu1 %v453_v42  ;;  %v447_v57 = vmul.f32 %v435_v48, %v399_v51  ;;  %v612_v20 = vpop.permute.xlu1 %611 }
 0x117   : > { %v438_v56 = vadd.f32 1.0, %v1087_v50  ;;  %v448_v59 = vmul.f32 %v436_v49, %v400_v54  ;;  %v723_v33 = vpop.permute.xlu0 %722 }
 0x118   : > { %v449_v58 = vmul.f32 %v437_v53, %v401_v52 }
 0x119   : > { %v450_v60 = vmul.f32 %v438_v56, %v402_v55  ;;  %948 = vmatmul.mubr.msk.bf16.gmra.mrb[4].mxu1 %vm318_vm0, %v1059_v47 }
 0x11a   : > { %v455_v62 = vpack.c.bf16 %v449_v58, %v447_v57  ;;  %662 = vmatprep.mubr.bf16.mxu1 %v1168_v0  ;;  %v728_v32 = vpop.permute.xlu1 %727 }
 0x11b   : > { %v456_v63 = vpack.c.bf16 %v450_v60, %v448_v59  ;;  %v733_v55 = vpop.permute.xlu0 %732 }
 0x11d   : > { %756 = vmatprep.subr.bf16.mxu0 %v456_v63 }
 0x11e   : > { %757 = vmatpush1.bf16.msra.mxu0 %v455_v62  ;;  %v738_v54 = vpop.permute.xlu1 %737 }
 0x121   : > { %959 = vmatmul.mubr.msk.bf16.vlgmr.msra.gmra.mrb[8].mxu1 %vm318_vm0, %v1060_v61  ;;  %971 = vmatmul.mubr.msk.bf16.vlgmr.msra.gmra.mrb[12].mxu0 %vm318_vm0, %v1061_v1 }
 0x122   : > { %672 = vmatprep.mubr.bf16.mxu1 %v1168_v0  ;;  %798 = vmatprep.mubr.bf16.mxu0 %v1168_v0 }
 0x129   : > { %960 = vmatmul.mubr.msk.bf16.gmra.mrb[12].mxu1 %vm318_vm0, %v1062_v2  ;;  %972 = vmatmul.mubr.msk.bf16.gmra.mrb[16].mxu0 %vm318_vm0, %v1063_v3 }
 0x1e4   : > { %v535_v0 = vpop.f32.mrb[0].mxu1 }
 0x1e5   : > { %v536_v8 = vadd.f32 %v535_v0, %v468_v5  ;;  %v537_v9 = vpop.f32.mrb[1].mxu1 }
 0x1e6   : > { %v538_v11 = vadd.f32 %v537_v9, %v468_v5  ;;  %v539_v12 = vpop.f32.mrb[2].mxu1 }
 0x1e7   : > { %v540_v15 = vadd.f32 %v539_v12, %v473_v4  ;;  %v541_v16 = vpop.f32.mrb[3].mxu1 }
 0x1e8   : > { %v981_v17 = vpack.c.bf16 %v538_v11, %v536_v8  ;;  %v542_v18 = vadd.f32 %v541_v16, %v473_v4 }
 0x1ea   : > { %581 = vst.msk [vmem:[%s1370_s8] sm:$0xff] %vm1366_vm3, %v981_v17  ;;  %v982_v19 = vpack.c.bf16 %v542_v18, %v540_v15 }
 0x1ec   : > { %582 = vst.msk [vmem:[%s1370_s8 + $0x8] sm:$0xff] %vm1366_vm3, %v982_v19  ;;  %v545_v21 = vpop.f32.mrb[4].mxu1 }
 0x1ed   : > { %v546_v23 = vadd.f32 %v545_v21, %v478_v7  ;;  %v547_v24 = vpop.f32.mrb[5].mxu1 }
 0x1ee   : > { %v548_v25 = vadd.f32 %v547_v24, %v478_v7  ;;  %v549_v26 = vpop.f32.mrb[6].mxu1 }
 0x1ef   : > { %v550_v27 = vadd.f32 %v549_v26, %v483_v6  ;;  %v551_v28 = vpop.f32.mrb[7].mxu1 }
 0x1f0   : > { %v983_v29 = vpack.c.bf16 %v548_v25, %v546_v23  ;;  %v552_v30 = vadd.f32 %v551_v28, %v483_v6 }
 0x1f2   : > { %583 = vst.msk [vmem:[%s1370_s8 + $0x10] sm:$0xff] %vm1366_vm3, %v983_v29  ;;  %v984_v31 = vpack.c.bf16 %v552_v30, %v550_v27 }
 0x1f4   : > { %584 = vst.msk [vmem:[%s1370_s8 + $0x18] sm:$0xff] %vm1366_vm3, %v984_v31  ;;  %v664_v34 = vpop.f32.mrb[8].mxu1  ;;  %v790_v35 = vpop.f32.mrb[12].mxu0 }
 0x1f5   : > { %v665_v36 = vadd.f32 %v664_v34, %v597_v13  ;;  %v791_v37 = vadd.f32 %v790_v35, %v723_v33  ;;  %v666_v38 = vpop.f32.mrb[9].mxu1  ;;  %v792_v39 = vpop.f32.mrb[13].mxu0 }
 0x1f6   : > { %v667_v40 = vadd.f32 %v666_v38, %v597_v13  ;;  %v793_v41 = vadd.f32 %v792_v39, %v723_v33  ;;  %v668_v42 = vpop.f32.mrb[10].mxu1  ;;  %v794_v43 = vpop.f32.mrb[14].mxu0 }
 0x1f7   : > { %v669_v45 = vadd.f32 %v668_v42, %v602_v10  ;;  %v795_v46 = vadd.f32 %v794_v43, %v728_v32  ;;  %v670_v48 = vpop.f32.mrb[11].mxu1  ;;  %v796_v44 = vpop.f32.mrb[15].mxu0 }
 0x1f8   : > { %v985_v49 = vpack.c.bf16 %v667_v40, %v665_v36  ;;  %v989_v47 = vpack.c.bf16 %v793_v41, %v791_v37  ;;  %v671_v50 = vadd.f32 %v670_v48, %v602_v10  ;;  %v797_v51 = vadd.f32 %v796_v44, %v728_v32 }
 0x1fa   : > { %707 = vst.msk [vmem:[%s1370_s8 + $0x20] sm:$0xff] %vm1366_vm3, %v985_v49  ;;  %833 = vst.msk [vmem:[%s1370_s8 + $0x40] sm:$0xff] %vm1366_vm3, %v989_v47  ;;  %v986_v52 = vpack.c.bf16 %v671_v50, %v669_v45  ;;  %v990_v53 = vpack.c.bf16 %v797_v51, %v795_v46 }
 0x1fc   : > { %708 = vst.msk [vmem:[%s1370_s8 + $0x28] sm:$0xff] %vm1366_vm3, %v986_v52  ;;  %834 = vst.msk [vmem:[%s1370_s8 + $0x48] sm:$0xff] %vm1366_vm3, %v990_v53  ;;  %v674_v56 = vpop.f32.mrb[12].mxu1  ;;  %v800_v57 = vpop.f32.mrb[16].mxu0 }
 0x1fd   : > { %v675_v58 = vadd.f32 %v674_v56, %v607_v22  ;;  %v801_v59 = vadd.f32 %v800_v57, %v733_v55  ;;  %v676_v60 = vpop.f32.mrb[13].mxu1  ;;  %v802_v62 = vpop.f32.mrb[17].mxu0 }
 0x1fe   : > { %v677_v63 = vadd.f32 %v676_v60, %v607_v22  ;;  %v803_v61 = vadd.f32 %v802_v62, %v733_v55  ;;  %v678_v1 = vpop.f32.mrb[14].mxu1  ;;  %v804_v2 = vpop.f32.mrb[18].mxu0 }
 0x1ff   : > { %v679_v3 = vadd.f32 %v678_v1, %v612_v20  ;;  %v805_v4 = vadd.f32 %v804_v2, %v738_v54  ;;  %v680_v5 = vpop.f32.mrb[15].mxu1  ;;  %v806_v6 = vpop.f32.mrb[19].mxu0 }
 0x200   : > { %v987_v7 = vpack.c.bf16 %v677_v63, %v675_v58  ;;  %v991_v0 = vpack.c.bf16 %v803_v61, %v801_v59  ;;  %v681_v8 = vadd.f32 %v680_v5, %v612_v20  ;;  %v807_v9 = vadd.f32 %v806_v6, %v738_v54 }
 0x202   : > { %709 = vst.msk [vmem:[%s1370_s8 + $0x30] sm:$0xff] %vm1366_vm3, %v987_v7  ;;  %835 = vst.msk [vmem:[%s1370_s8 + $0x50] sm:$0xff] %vm1366_vm3, %v991_v0  ;;  %v988_v10 = vpack.c.bf16 %v681_v8, %v679_v3  ;;  %v992_v11 = vpack.c.bf16 %v807_v9, %v805_v4 }
 0x204   : > { %710 = vst.msk [vmem:[%s1370_s8 + $0x38] sm:$0xff] %vm1366_vm3, %v988_v10  ;;  %836 = vst.msk [vmem:[%s1370_s8 + $0x58] sm:$0xff] %vm1366_vm3, %v992_v11 }
 0x205   : > { %1101 = shalt.err (!%p1098_p5)
}
 0x206   : > { %s1102_s24 = scalar_lea.hbm %s1409_s12, 1536  ;;  %s1106_s29 = scalar_lea.hbm %s1470_s5, 3072 }
 0x207   : > { %p1103_p6 = scmp.ne.s32.totalorder %s1409_s12, %s1102_s24  ;;  %p1107_p10 = scmp.lt.u32.totalorder %s1409_s12, %s1470_s5 }
 0x208   : > { %p1108_p11 = scmp.lt.u32.totalorder %s1106_s29, %s1102_s24  ;;  %p1110_p13 = scmp.lt.u32.totalorder %s1102_s24, %s1409_s12 }
 0x209   : > { %p1104_p7 = pnand %p1103_p6, %p1242_p4 }
 0x20a   : > { %p1109_p12 = por %p1108_p11, %p1107_p10 }
 0x20b   : > { %p1105_p9 = pneg %p1104_p7 }
 0x20c   : > { %p1111_p0 = por %p1110_p13, %p1109_p12 }
 0x20e   : > { %p1112_p1 = pnand %p1111_p0, %p1105_p9 }
 0x210   : > { %1115 = shalt.err (!%p1112_p1)
}
 0x211   : > { %s1170_s9 = smov 128   ;;  %s1171_s21 = smov 8  }
 0x212   : > { %995 = dma.vmem_to_hbm [thread:$0]  (%p1242_p4), %s1398_s10, 1536, %s1409_s12, %s1419_s13, %s1170_s9, %s1170_s9, %s1171_s21  }
 0x213 PF: > { %p1001_p2 = scmp.ge.s32.totalorder %s1166_s23, 2  ;;  %s868_s11 = sand.u32 1, %s1146_s18  }
 0x214   : > { %s869_s14 = scalar_lea.sflag [#allocation3], %s868_s11 }
 0x215   : > { %p998_p3 = pnand %p1001_p2, %p1249_p8 }
 0x217   : > { %1141 = dma.done.wait (!%p998_p3), %s869_s14, 1536  }
 0x218   : > { %1143 = vsyncadd (!%p998_p3), %s869_s14, 4294965760  ;;  %s18_s23 = sadd.s32 1, %s1166_s23   ;;  %s1475_s18 = smov %s1150_s19 }
 0x219   : > { %p15_p5 = scmp.ge.s32.totalorder %s18_s23, 4   ;;  %s1476_s19 = smov %s1154_s20 }
 0x21a   : > { %s1477_s20 = smov %s1255_s6  ;;  %s1478_s21 = smov %s1162_s22 }
 0x21b   : > { %s1479_s22 = smov %s1481_s26  ;;  %17 = sbr.rel (!%p15_p5) target bundleno = 4 (0x4), region = 77 }
 0x222   :  { %874 = vsyncpa [#allocation3], 1 }
 0x223   :  { %876 = vsyncpa [#allocation3 + $0x1], 1 }

</bundles_post_ra>
